<compile_context>
chip_gen: v7x
topology: tpu7x:2x2x1
jax: 0.10.0
libtpu: 0.0.40
codegen_flags: <defaults>
</compile_context>

<pallas_src>
import jax
import jax.numpy as jnp
from jax.experimental import pallas as pl
from jax.experimental.pallas import tpu as pltpu

EPS = 1e-5


def _bn_relu(h, gamma, beta):
    """Training-mode BatchNorm1d + ReLU, affine folded into scale/shift.

    Two-pass stats (mean, then E[(h-mean)^2]) for numerical stability; the
    centered slab `d` is reused, so normalisation on the [B, N] slab is just
    d * scale + beta, then ReLU.
    """
    mean = jnp.mean(h, axis=0, keepdims=True)            # [1, N]
    d = h - mean
    var = jnp.mean(d * d, axis=0, keepdims=True)         # biased var (training mode)
    scale = gamma * jax.lax.rsqrt(var + EPS)             # [1, N]
    return jnp.maximum(d * scale + beta, 0.0)


def _mlp_decoder_kernel(x_ref, w1_ref, bn1_ref, w2_ref, bn2_ref, w3_ref, b3_ref,
                        o_ref, h2_acc):
    j = pl.program_id(0)

    @pl.when(j == 0)
    def _():
        h2_acc[...] = jnp.zeros_like(h2_acc)

    # --- fc1, hidden-column tile j (bias dropped: cancelled by BN1) + BN1 + ReLU ---
    h1 = jnp.dot(x_ref[...], w1_ref[...], preferred_element_type=jnp.float32)
    h1 = _bn_relu(h1, bn1_ref[0:1, :], bn1_ref[1:2, :])

    # --- partial fc2: this hidden tile's contribution to the K-reduction ---
    h2_acc[...] += jnp.dot(h1.astype(jnp.bfloat16), w2_ref[...],
                           preferred_element_type=jnp.float32)

    # --- finalize: BN2 + ReLU + fc3 on the last hidden tile ---
    @pl.when(j == pl.num_programs(0) - 1)
    def _():
        h2 = _bn_relu(h2_acc[...], bn2_ref[0:1, :], bn2_ref[1:2, :])
        out = jnp.dot(h2.astype(jnp.bfloat16), w3_ref[...],
                      preferred_element_type=jnp.float32) + b3_ref[...]
        o_ref[...] = out.astype(o_ref.dtype)


def _pick_hidden_tile(hidden_dim):
    # Largest MXU-friendly (multiple-of-128) tile dividing hidden_dim, capped at 512;
    # fall back to the full dimension for toy sizes (block == full dim is always legal).
    for tn in (512, 256, 128):
        if hidden_dim % tn == 0:
            return tn
    return hidden_dim


@jax.jit
def mlp_decoder_forward(features, latent_vector, params):
    """features: [B, input_dim], latent_vector: [B, latent_dim] -> [B, output_dim] f32."""
    # Fused concat operand in bf16: one MXU dot for fc1, halved input HBM bytes.
    x = jnp.concatenate([features, latent_vector], axis=-1).astype(jnp.bfloat16)
    B, K1 = x.shape
    H = params["w2"].shape[0]
    out_dim = params["w3"].shape[1]
    tn = _pick_hidden_tile(H)
    grid = (H // tn,)

    # VMEM budget: all blocks double-buffered by the pipeline + resident accumulator.
    block_bytes = (B * K1 * 2 + K1 * tn * 2 + 2 * tn * 4 + tn * H * 2
                   + 2 * H * 4 + H * out_dim * 2 + out_dim * 4 + B * out_dim * 4)
    need = 2 * block_bytes + B * H * 4 + (4 << 20)
    try:
        vmem_cap = pltpu.get_tpu_info().vmem_capacity_bytes
    except Exception:
        vmem_cap = 64 << 20   # v7x per-TensorCore VMEM: smallest in the fleet
    vmem_limit = int(min(max(need, 16 << 20), vmem_cap - (16 << 20)))

    cost = pl.CostEstimate(
        flops=2 * B * (K1 * H + H * H + H * out_dim),
        transcendentals=2 * H,                               # rsqrt per BN feature
        bytes_accessed=int(x.size * 2
                           + params["w1"].size * 2 + params["w2"].size * 2
                           + params["w3"].size * 2
                           + params["bn1"].size * 4 + params["bn2"].size * 4
                           + params["b3"].size * 4 + B * out_dim * 4))

    return pl.pallas_call(
        _mlp_decoder_kernel,
        out_shape=jax.ShapeDtypeStruct((B, out_dim), jnp.float32),
        grid_spec=pltpu.PrefetchScalarGridSpec(
            num_scalar_prefetch=0,
            grid=grid,
            in_specs=[
                pl.BlockSpec((B, K1), lambda j: (0, 0)),        # x   (resident)
                pl.BlockSpec((K1, tn), lambda j: (0, j)),       # w1  (streamed col tiles)
                pl.BlockSpec((2, tn), lambda j: (0, j)),        # bn1 (streamed col tiles)
                pl.BlockSpec((tn, H), lambda j: (j, 0)),        # w2  (streamed row tiles)
                pl.BlockSpec((2, H), lambda j: (0, 0)),         # bn2 (resident)
                pl.BlockSpec((H, out_dim), lambda j: (0, 0)),   # w3  (resident)
                pl.BlockSpec((1, out_dim), lambda j: (0, 0)),   # b3  (resident)
            ],
            out_specs=pl.BlockSpec((B, out_dim), lambda j: (0, 0)),
            scratch_shapes=[pltpu.VMEM((B, H), jnp.float32)],   # fc2 K-reduction acc
        ),
        compiler_params=pltpu.CompilerParams(
            dimension_semantics=("arbitrary",),                 # hidden axis = reduction
            vmem_limit_bytes=vmem_limit),
        cost_estimate=cost,
    )(x, params["w1"], params["bn1"], params["w2"], params["bn2"],
      params["w3"], params["b3"])


def init_params(key, input_dim, latent_dim, hidden_dim, output_dim):
    """Deterministic parameter init (PyTorch-style uniform bounds)."""
    ks = jax.random.split(key, 6)

    def linear(kw, kb, fan_in, fan_out):
        bound = 1.0 / jnp.sqrt(fan_in)
        w = jax.random.uniform(kw, (fan_in, fan_out), jnp.float32, -bound, bound)
        b = jax.random.uniform(kb, (1, fan_out), jnp.float32, -bound, bound)
        return w, b

    # fc1 / fc2 biases are initialized in PyTorch but are mathematically inert under
    # training-mode BatchNorm (mean subtraction), so they are not materialized here.
    w1, _ = linear(ks[0], ks[1], input_dim + latent_dim, hidden_dim)
    w2, _ = linear(ks[2], ks[3], hidden_dim, hidden_dim)
    w3, b3 = linear(ks[4], ks[5], hidden_dim, output_dim)

    # BatchNorm1d affine params, rows = [gamma, beta].
    bn = jnp.concatenate([jnp.ones((1, hidden_dim), jnp.float32),
                          jnp.zeros((1, hidden_dim), jnp.float32)], axis=0)

    return dict(
        w1=w1.astype(jnp.bfloat16),   # bf16 MXU operands (~1e-2 rel err vs f32 torch)
        w2=w2.astype(jnp.bfloat16),
        w3=w3.astype(jnp.bfloat16),
        b3=b3,                        # f32, added after the f32-accumulated dot
        bn1=bn,
        bn2=bn,
    )


if __name__ == "__main__":
    B = 8
    input_dim, latent_dim, hidden_dim, output_dim = 16, 16, 32, 8

    key = jax.random.PRNGKey(0)
    k_feat, k_lat, k_params = jax.random.split(key, 3)

    features = jax.random.normal(k_feat, (B, input_dim), jnp.float32)
    latent_vector = jax.random.normal(k_lat, (B, latent_dim), jnp.float32)
    params = init_params(k_params, input_dim, latent_dim, hidden_dim, output_dim)

    out = mlp_decoder_forward(features, latent_vector, params)
    out = jax.block_until_ready(out)
    assert out.shape == (B, output_dim)
    assert bool(jnp.all(jnp.isfinite(out)))

    print("KERNEL_OK")
</pallas_src>

<mosaic_0001>
module attributes {stable_mosaic.version = 11 : i64} {
  func.func @_mlp_decoder_kernel(%arg0: i32, %arg1: memref<8x32xbf16, #tpu.memory_space<vmem>>, %arg2: memref<32x32xbf16, #tpu.memory_space<vmem>>, %arg3: memref<2x32xf32, #tpu.memory_space<vmem>>, %arg4: memref<32x32xbf16, #tpu.memory_space<vmem>>, %arg5: memref<2x32xf32, #tpu.memory_space<vmem>>, %arg6: memref<32x8xbf16, #tpu.memory_space<vmem>>, %arg7: memref<1x8xf32, #tpu.memory_space<vmem>>, %arg8: memref<8x8xf32, #tpu.memory_space<vmem>>, %arg9: memref<8x32xf32, #tpu.memory_space<vmem>>) attributes {dimension_semantics = [#tpu.dimension_semantics<arbitrary>], iteration_bounds = array<i64: 1>, scalar_prefetch = 0 : i64, scratch_operands = 1 : i64, tpu.core_type = #tpu.core_type<tc>, window_params = [{pipeline_mode = #tpu.pipeline_mode<synchronous>, transform_indices = @transform_0, window_bounds = array<i64: 8, 32>}, {transform_indices = @transform_1, window_bounds = array<i64: 32, 32>}, {transform_indices = @transform_2, window_bounds = array<i64: 2, 32>}, {transform_indices = @transform_3, window_bounds = array<i64: 32, 32>}, {pipeline_mode = #tpu.pipeline_mode<synchronous>, transform_indices = @transform_4, window_bounds = array<i64: 2, 32>}, {pipeline_mode = #tpu.pipeline_mode<synchronous>, transform_indices = @transform_5, window_bounds = array<i64: 32, 8>}, {pipeline_mode = #tpu.pipeline_mode<synchronous>, transform_indices = @transform_6, window_bounds = array<i64: 1, 8>}, {pipeline_mode = #tpu.pipeline_mode<synchronous>, transform_indices = @transform_7, window_bounds = array<i64: 8, 8>}]} {
    %c0_i32 = arith.constant 0 : i32
    %0 = arith.cmpi eq, %arg0, %c0_i32 : i32
    %1 = arith.extui %0 : i1 to i32
    %c0_i32_0 = arith.constant 0 : i32
    %2 = arith.cmpi ne, %1, %c0_i32_0 : i32
    scf.if %2 {
      %cst_22 = arith.constant 0.000000e+00 : f32
      %38 = vector.broadcast %cst_22 : f32 to vector<8x32xf32>
      %c0_23 = arith.constant 0 : index
      %c0_24 = arith.constant 0 : index
      %39 = vector.load %arg9[%c0_23, %c0_24] : memref<8x32xf32, #tpu.memory_space<vmem>>, vector<8x32xf32>
      tpu.vector_store %arg9[%c0_23, %c0_24], %38 {strides = array<i32>} : memref<8x32xf32, #tpu.memory_space<vmem>>, vector<8x32xf32>,
    } else {
    }
    %c0 = arith.constant 0 : index
    %c0_1 = arith.constant 0 : index
    %3 = vector.load %arg1[%c0, %c0_1] : memref<8x32xbf16, #tpu.memory_space<vmem>>, vector<8x32xbf16>
    %c0_2 = arith.constant 0 : index
    %c0_3 = arith.constant 0 : index
    %4 = vector.load %arg2[%c0_2, %c0_3] : memref<32x32xbf16, #tpu.memory_space<vmem>>, vector<32x32xbf16>
    %cst = arith.constant dense<0.000000e+00> : vector<8x32xf32>
    %5 = tpu.matmul %3, %4, %cst {dimension_numbers = #tpu.dot_dimension_numbers<[1], [0], [0], [1], [0, 0, 1, 1], [], []>} : vector<8x32xbf16>, vector<32x32xbf16>, vector<8x32xf32> -> vector<8x32xf32>
    %c0_4 = arith.constant 0 : index
    %c0_5 = arith.constant 0 : index
    %6 = vector.load %arg3[%c0_4, %c0_5] : memref<2x32xf32, #tpu.memory_space<vmem>>, vector<1x32xf32>
    %c1 = arith.constant 1 : index
    %c0_6 = arith.constant 0 : index
    %7 = vector.load %arg3[%c1, %c0_6] : memref<2x32xf32, #tpu.memory_space<vmem>>, vector<1x32xf32>
    %cst_7 = arith.constant dense<0.000000e+00> : vector<32xf32>
    %8 = vector.multi_reduction <add>, %5, %cst_7 [0] : vector<8x32xf32> to vector<32xf32>
    %9 = vector.shape_cast %8 : vector<32xf32> to vector<1x32xf32>
    %cst_8 = arith.constant 8.000000e+00 : f32
    %10 = vector.broadcast %cst_8 : f32 to vector<1x32xf32>
    %11 = arith.divf %9, %10 : vector<1x32xf32>
    %12 = vector.broadcast %11 : vector<1x32xf32> to vector<8x32xf32>
    %13 = arith.subf %5, %12 : vector<8x32xf32>
    %14 = arith.mulf %13, %13 : vector<8x32xf32>
    %cst_9 = arith.constant dense<0.000000e+00> : vector<32xf32>
    %15 = vector.multi_reduction <add>, %14, %cst_9 [0] : vector<8x32xf32> to vector<32xf32>
    %16 = vector.shape_cast %15 : vector<32xf32> to vector<1x32xf32>
    %cst_10 = arith.constant 8.000000e+00 : f32
    %17 = vector.broadcast %cst_10 : f32 to vector<1x32xf32>
    %18 = arith.divf %16, %17 : vector<1x32xf32>
    %cst_11 = arith.constant 9.99999974E-6 : f32
    %19 = vector.broadcast %cst_11 : f32 to vector<1x32xf32>
    %20 = arith.addf %18, %19 : vector<1x32xf32>
    %21 = math.rsqrt %20 : vector<1x32xf32>
    %22 = arith.mulf %6, %21 : vector<1x32xf32>
    %23 = vector.broadcast %22 : vector<1x32xf32> to vector<8x32xf32>
    %24 = arith.mulf %13, %23 : vector<8x32xf32>
    %25 = vector.broadcast %7 : vector<1x32xf32> to vector<8x32xf32>
    %26 = arith.addf %24, %25 : vector<8x32xf32>
    %cst_12 = arith.constant 0.000000e+00 : f32
    %27 = vector.broadcast %cst_12 : f32 to vector<8x32xf32>
    %28 = arith.maximumf %26, %27 : vector<8x32xf32>
    %c0_13 = arith.constant 0 : index
    %c0_14 = arith.constant 0 : index
    %29 = vector.load %arg9[%c0_13, %c0_14] : memref<8x32xf32, #tpu.memory_space<vmem>>, vector<8x32xf32>
    %30 = arith.truncf %28 : vector<8x32xf32> to vector<8x32xbf16>
    %c0_15 = arith.constant 0 : index
    %c0_16 = arith.constant 0 : index
    %31 = vector.load %arg4[%c0_15, %c0_16] : memref<32x32xbf16, #tpu.memory_space<vmem>>, vector<32x32xbf16>
    %cst_17 = arith.constant dense<0.000000e+00> : vector<8x32xf32>
    %32 = tpu.matmul %30, %31, %cst_17 {dimension_numbers = #tpu.dot_dimension_numbers<[1], [0], [0], [1], [0, 0, 1, 1], [], []>} : vector<8x32xbf16>, vector<32x32xbf16>, vector<8x32xf32> -> vector<8x32xf32>
    %33 = arith.addf %29, %32 : vector<8x32xf32>
    %c0_18 = arith.constant 0 : index
    %c0_19 = arith.constant 0 : index
    %34 = vector.load %arg9[%c0_18, %c0_19] : memref<8x32xf32, #tpu.memory_space<vmem>>, vector<8x32xf32>
    tpu.vector_store %arg9[%c0_18, %c0_19], %33 {strides = array<i32>} : memref<8x32xf32, #tpu.memory_space<vmem>>, vector<8x32xf32>,
    %c0_i32_20 = arith.constant 0 : i32
    %35 = arith.cmpi eq, %arg0, %c0_i32_20 : i32
    %36 = arith.extui %35 : i1 to i32
    %c0_i32_21 = arith.constant 0 : i32
    %37 = arith.cmpi ne, %36, %c0_i32_21 : i32
    scf.if %37 {
      %c0_22 = arith.constant 0 : index
      %c0_23 = arith.constant 0 : index
      %38 = vector.load %arg9[%c0_22, %c0_23] : memref<8x32xf32, #tpu.memory_space<vmem>>, vector<8x32xf32>
      %c0_24 = arith.constant 0 : index
      %c0_25 = arith.constant 0 : index
      %39 = vector.load %arg5[%c0_24, %c0_25] : memref<2x32xf32, #tpu.memory_space<vmem>>, vector<1x32xf32>
      %c1_26 = arith.constant 1 : index
      %c0_27 = arith.constant 0 : index
      %40 = vector.load %arg5[%c1_26, %c0_27] : memref<2x32xf32, #tpu.memory_space<vmem>>, vector<1x32xf32>
      %cst_28 = arith.constant dense<0.000000e+00> : vector<32xf32>
      %41 = vector.multi_reduction <add>, %38, %cst_28 [0] : vector<8x32xf32> to vector<32xf32>
      %42 = vector.shape_cast %41 : vector<32xf32> to vector<1x32xf32>
      %cst_29 = arith.constant 8.000000e+00 : f32
      %43 = vector.broadcast %cst_29 : f32 to vector<1x32xf32>
      %44 = arith.divf %42, %43 : vector<1x32xf32>
      %45 = vector.broadcast %44 : vector<1x32xf32> to vector<8x32xf32>
      %46 = arith.subf %38, %45 : vector<8x32xf32>
      %47 = arith.mulf %46, %46 : vector<8x32xf32>
      %cst_30 = arith.constant dense<0.000000e+00> : vector<32xf32>
      %48 = vector.multi_reduction <add>, %47, %cst_30 [0] : vector<8x32xf32> to vector<32xf32>
      %49 = vector.shape_cast %48 : vector<32xf32> to vector<1x32xf32>
      %cst_31 = arith.constant 8.000000e+00 : f32
      %50 = vector.broadcast %cst_31 : f32 to vector<1x32xf32>
      %51 = arith.divf %49, %50 : vector<1x32xf32>
      %cst_32 = arith.constant 9.99999974E-6 : f32
      %52 = vector.broadcast %cst_32 : f32 to vector<1x32xf32>
      %53 = arith.addf %51, %52 : vector<1x32xf32>
      %54 = math.rsqrt %53 : vector<1x32xf32>
      %55 = arith.mulf %39, %54 : vector<1x32xf32>
      %56 = vector.broadcast %55 : vector<1x32xf32> to vector<8x32xf32>
      %57 = arith.mulf %46, %56 : vector<8x32xf32>
      %58 = vector.broadcast %40 : vector<1x32xf32> to vector<8x32xf32>
      %59 = arith.addf %57, %58 : vector<8x32xf32>
      %cst_33 = arith.constant 0.000000e+00 : f32
      %60 = vector.broadcast %cst_33 : f32 to vector<8x32xf32>
      %61 = arith.maximumf %59, %60 : vector<8x32xf32>
      %62 = arith.truncf %61 : vector<8x32xf32> to vector<8x32xbf16>
      %c0_34 = arith.constant 0 : index
      %c0_35 = arith.constant 0 : index
      %63 = vector.load %arg6[%c0_34, %c0_35] : memref<32x8xbf16, #tpu.memory_space<vmem>>, vector<32x8xbf16>
      %cst_36 = arith.constant dense<0.000000e+00> : vector<8x8xf32>
      %64 = tpu.matmul %62, %63, %cst_36 {dimension_numbers = #tpu.dot_dimension_numbers<[1], [0], [0], [1], [0, 0, 1, 1], [], []>} : vector<8x32xbf16>, vector<32x8xbf16>, vector<8x8xf32> -> vector<8x8xf32>
      %c0_37 = arith.constant 0 : index
      %c0_38 = arith.constant 0 : index
      %65 = vector.load %arg7[%c0_37, %c0_38] : memref<1x8xf32, #tpu.memory_space<vmem>>, vector<1x8xf32>
      %66 = vector.broadcast %65 : vector<1x8xf32> to vector<8x8xf32>
      %67 = arith.addf %64, %66 : vector<8x8xf32>
      %c0_39 = arith.constant 0 : index
      %c0_40 = arith.constant 0 : index
      %68 = vector.load %arg8[%c0_39, %c0_40] : memref<8x8xf32, #tpu.memory_space<vmem>>, vector<8x8xf32>
      tpu.vector_store %arg8[%c0_39, %c0_40], %67 {strides = array<i32>} : memref<8x8xf32, #tpu.memory_space<vmem>>, vector<8x8xf32>,
    } else {
    }
    return
  }
  func.func @transform_0(%arg0: i32) -> (i32, i32) {
    %c0_i32 = arith.constant 0 : i32
    %c0_i32_0 = arith.constant 0 : i32
    %c0_i32_1 = arith.constant 0 : i32
    return %c0_i32, %c0_i32_0 : i32, i32
  }
  func.func @transform_1(%arg0: i32) -> (i32, i32) {
    %c0_i32 = arith.constant 0 : i32
    %c0_i32_0 = arith.constant 0 : i32
    return %c0_i32, %arg0 : i32, i32
  }
  func.func @transform_2(%arg0: i32) -> (i32, i32) {
    %c0_i32 = arith.constant 0 : i32
    %c0_i32_0 = arith.constant 0 : i32
    return %c0_i32, %arg0 : i32, i32
  }
  func.func @transform_3(%arg0: i32) -> (i32, i32) {
    %c0_i32 = arith.constant 0 : i32
    %c0_i32_0 = arith.constant 0 : i32
    return %arg0, %c0_i32 : i32, i32
  }
  func.func @transform_4(%arg0: i32) -> (i32, i32) {
    %c0_i32 = arith.constant 0 : i32
    %c0_i32_0 = arith.constant 0 : i32
    %c0_i32_1 = arith.constant 0 : i32
    return %c0_i32, %c0_i32_0 : i32, i32
  }
  func.func @transform_5(%arg0: i32) -> (i32, i32) {
    %c0_i32 = arith.constant 0 : i32
    %c0_i32_0 = arith.constant 0 : i32
    %c0_i32_1 = arith.constant 0 : i32
    return %c0_i32, %c0_i32_0 : i32, i32
  }
  func.func @transform_6(%arg0: i32) -> (i32, i32) {
    %c0_i32 = arith.constant 0 : i32
    %c0_i32_0 = arith.constant 0 : i32
    %c0_i32_1 = arith.constant 0 : i32
    return %c0_i32, %c0_i32_0 : i32, i32
  }
  func.func @transform_7(%arg0: i32) -> (i32, i32) {
    %c0_i32 = arith.constant 0 : i32
    %c0_i32_0 = arith.constant 0 : i32
    %c0_i32_1 = arith.constant 0 : i32
    return %c0_i32, %c0_i32_0 : i32, i32
  }
}

</mosaic_0001>

<bundles_post_ra>
// kernel: mlp_decoder_forward.1
= control target key start
LH: loop header
LB: loop body
LE: loop exit
PB: predicated region body
PF: predicated region fallthrough
CT: control target
= control target key end

     0   :  { %v396_v1 = vmov 0.0   ;;  %vm397_vm0 = vmmov 0   ;;  %vm32_vm1 = vcmask 261120   ;;  %s496_s0 = inlined_call_operand.vmem [shape: bf16[8,32], index: 0, kind: input, shape index: {}]   ;;  %s497_s1 = inlined_call_operand.vmem [shape: bf16[32,32], index: 1, kind: input, shape index: {}]   ;;  %s498_s2 = inlined_call_operand.vmem [shape: f32[2,32], index: 2, kind: input, shape index: {}]   ;;  %s499_s3 = inlined_call_operand.vmem [shape: bf16[32,32], index: 3, kind: input, shape index: {}]   ;;  %s500_s4 = inlined_call_operand.vmem [shape: f32[2,32], index: 4, kind: input, shape index: {}]   ;;  %s501_s5 = inlined_call_operand.vmem [shape: bf16[32,8], index: 5, kind: input, shape index: {}]   ;;  %s502_s6 = inlined_call_operand.vmem [shape: f32[1,8], index: 6, kind: input, shape index: {}]   ;;  %s503_s7 = inlined_call_operand.hbm [shape: f32[8,8], index: 7, kind: output, shape index: {}]  }
   0x1   :  { %v362_v0 = vld [vmem:[%s497_s1] sm:$0xff]   ;;  %335 = vmatprep.subr.bf16.mxu0 %v396_v1  ;;  %343 = vmatprep.subr.bf16.mxu1 %v396_v1  ;;  %v363_v2 = vld [vmem:[%s497_s1 + $0x8] sm:$0xff]   ;;  %33 = vst.msk [vmem:[#allocation2] sm:$0xff] %vm32_vm1, %v396_v1 }
   0x2   :  { %336 = vmatpush3.bf16.msra.mxu0 %v362_v0  ;;  %339 = vmatprep.mubr.msk.bf16.mxu0 %vm397_vm0, %v396_v1 }
   0x3   :  { %337 = vmatprep.subr.bf16.mxu0 %v396_v1  ;;  %347 = vmatprep.mubr.msk.bf16.mxu1 %vm397_vm0, %v396_v1 }
   0x4   :  { %12 = vsyncpa [#allocation4], 0  ;;  %v34_v3 = vld [vmem:[%s496_s0] sm:$0xf]  ;;  %v365_v5 = vld [vmem:[%s499_s3 + $0x8] sm:$0xff]   ;;  %v119_v29 = vlaneseq  ;;  %s398_s20 = smov [#allocation3]  }
   0x5   :  { %v364_v4 = vld [vmem:[%s499_s3] sm:$0xff]   ;;  %v367_v42 = vld [vmem:[%s501_s5 + $0x8] sm:$0xff]   ;;  %s306_s21 = sshll.u32 %s398_s20, 4  ;;  %vm298_vm2 = vcmask 64512   ;;  %s307_s21 = int_to_ptr.vmem [resolvable:$true] %s306_s21 }
   0x6   :  { %338 = vmatpush3.bf16.msra.mxu0 %v363_v2  ;;  %344 = vmatpush3.bf16.msra.mxu1 %v364_v4  ;;  %v120_v30 = vshrl.u32 %v119_v29, 7  ;;  %v95_v31 = vld [vmem:[%s498_s2] sm:$0x1]  ;;  %v317_v36 = vld [vmem:[%s498_s2 + $0x1] ss:$0 sm:$0xff]  ;;  %p377_p1 = scmp.lt.s32.totalorder %s307_s21, %s307_s21 }
   0x7   :  { %351 = vmatprep.subr.bf16.mxu0 %v396_v1  ;;  %345 = vmatprep.subr.bf16.mxu1 %v396_v1  ;;  %v366_v41 = vld [vmem:[%s501_s5] sm:$0xff]  }
   0x8   :  { %v121_v32 = vsub.s32 0, %v120_v30  ;;  %v130_v43 = vld [vmem:[#allocation2] sm:$0xff] }
   0x9   :  { %340 = vmatmul.mubr.msk.bf16.vlgmr.msra.gmra.mrb[0].mxu0 %vm32_vm1, %v34_v3 }
   0xa   :  { %355 = vmatprep.mubr.msk.bf16.mxu0 %vm397_vm0, %v396_v1  ;;  %346 = vmatpush3.bf16.msra.mxu1 %v365_v5  ;;  %v197_v5 = vld [vmem:[%s500_s4] sm:$0x1] }
   0xb   :  { %352 = vmatpush3.bf16.msra.mxu0 %v366_v41 }
   0xc   :  { %353 = vmatprep.subr.bf16.mxu0 %v396_v1 }
   0xf   :  { %354 = vmatpush3.bf16.msra.mxu0 %v367_v42 }
  0xdc   :  { %v89_v6 = vpop.f32.mrb[0].mxu0 }
  0xdd   :  { %v97_v7 = vsel %vm32_vm1, %v89_v6, 0.0  ;;  %v341_v8 = vpop.f32.mrb[1].mxu0 }
  0xde   :  { %v98_v9 = vrot.slane %v97_v7, 4  ;;  %v92_v10 = vpop.f32.mrb[2].mxu0 }
  0xdf   :  { %v342_v11 = vpop.f32.mrb[3].mxu0 }
  0xe0   :  { %v99_v12 = vadd.f32 %v98_v9, %v97_v7  ;;  %v321_v9 = vld [vmem:[%s500_s4 + $0x1] ss:$0 sm:$0xff]  ;;  %s372_s4 = scalar_lea.vmem %s307_s21, 128 }
  0xe1   :  { %p373_p0 = scmp.ne.s32.totalorder %s307_s21, %s372_s4  ;;  %p378_p2 = scmp.lt.s32.totalorder %s372_s4, %s372_s4 }
  0xe2   :  { %v100_v13 = vrot.slane %v99_v12, 2 }
  0xe3   :  { %p379_p3 = por %p378_p2, %p377_p1 }
  0xe4   :  { %v101_v14 = vadd.f32 %v100_v13, %v99_v12 }
  0xe5   :  { %p380_p4 = pnand %p379_p3, %p373_p0 }
  0xe6   :  { %v102_v15 = vrot.slane %v101_v14, 1 }
  0xe8   :  { %v103_v16 = vadd.f32 %v102_v15, %v101_v14  ;;  %v322_v14 = vld [vmem:[%s502_s6] ss:$0 sm:$0xff] }
  0xea   :  { %v105_v17 = vmul.f32 0.125, %v103_v16 }
  0xec   :  { %v106_v18 = vsub.f32 %v89_v6, %v105_v17 }
  0xee   :  { %v107_v19 = vmul.f32 %v106_v18, %v106_v18 }
  0xf0   :  { %v108_v20 = vsel %vm32_vm1, %v107_v19, 0.0 }
  0xf1   :  { %v109_v21 = vrot.slane %v108_v20, 4 }
  0xf3   :  { %v110_v22 = vadd.f32 %v109_v21, %v108_v20 }
  0xf5   :  { %v111_v23 = vrot.slane %v110_v22, 2 }
  0xf7   :  { %v112_v24 = vadd.f32 %v111_v23, %v110_v22 }
  0xf9   :  { %v113_v25 = vrot.slane %v112_v24, 1 }
  0xfb   :  { %v114_v26 = vadd.f32 %v113_v25, %v112_v24 }
  0xfd   :  { %v115_v27 = vmul.f32 0.125, %v114_v26 }
  0xff   :  { %v116_v28 = vadd.f32 1e-05, %v115_v27 }
 0x101   :  { %368 = vrsqrt.f32 %v116_v28 }
 0x10b   :  { %v369_v33 = vpop.eup %368 }
 0x10c   :  { %v118_v34 = vmul.f32 %v369_v33, %v95_v31 }
 0x10e   :  { %v122_v35 = vrot.slane %v118_v34, %v121_v32 }
 0x110   :  { %v123_v37 = vmul.f32 %v122_v35, %v106_v18 }
 0x112   :  { %v128_v38 = vadd.f32 %v317_v36, %v123_v37 }
 0x114   :  { %v129_v39 = vmax.f32 %v128_v38, 0.0 }
 0x116   :  { %v131_v40 = vpack.c.bf16 %v129_v39, %v129_v39 }
 0x118   :  { %348 = vmatmul.mubr.msk.bf16.vlgmr.msra.gmra.mrb[0].mxu1 %vm32_vm1, %v131_v40 }
 0x1eb   :  { %v185_v44 = vpop.f32.mrb[0].mxu1 }
 0x1ec   :  { %v191_v45 = vadd.f32 %v185_v44, %v130_v43  ;;  %v349_v46 = vpop.f32.mrb[1].mxu1 }
 0x1ed   :  { %v188_v47 = vpop.f32.mrb[2].mxu1 }
 0x1ee   :  { %192 = vst.msk [vmem:[#allocation2] sm:$0xff] %vm32_vm1, %v191_v45  ;;  %v350_v48 = vpop.f32.mrb[3].mxu1 }
 0x1f5   :  { %v196_v49 = vld [vmem:[#allocation2] sm:$0xff] }
 0x1f6   :  { %v199_v50 = vsel %vm32_vm1, %v196_v49, 0.0 }
 0x1f7   :  { %v200_v51 = vrot.slane %v199_v50, 4 }
 0x1f9   :  { %v201_v52 = vadd.f32 %v200_v51, %v199_v50 }
 0x1fb   :  { %v202_v53 = vrot.slane %v201_v52, 2 }
 0x1fd   :  { %v203_v54 = vadd.f32 %v202_v53, %v201_v52 }
 0x1ff   :  { %v204_v55 = vrot.slane %v203_v54, 1 }
 0x201   :  { %v205_v56 = vadd.f32 %v204_v55, %v203_v54 }
 0x203   :  { %v206_v57 = vmul.f32 0.125, %v205_v56 }
 0x205   :  { %v207_v58 = vsub.f32 %v196_v49, %v206_v57 }
 0x207   :  { %v208_v59 = vmul.f32 %v207_v58, %v207_v58 }
 0x209   :  { %v209_v60 = vsel %vm32_vm1, %v208_v59, 0.0 }
 0x20a   :  { %v210_v61 = vrot.slane %v209_v60, 4 }
 0x20c   :  { %v211_v62 = vadd.f32 %v210_v61, %v209_v60 }
 0x20e   :  { %v212_v63 = vrot.slane %v211_v62, 2 }
 0x210   :  { %v213_v0 = vadd.f32 %v212_v63, %v211_v62 }
 0x212   :  { %v214_v1 = vrot.slane %v213_v0, 1 }
 0x214   :  { %v215_v2 = vadd.f32 %v214_v1, %v213_v0 }
 0x216   :  { %v216_v3 = vmul.f32 0.125, %v215_v2 }
 0x218   :  { %v217_v4 = vadd.f32 1e-05, %v216_v3 }
 0x21a   :  { %370 = vrsqrt.f32 %v217_v4 }
 0x224   :  { %v371_v6 = vpop.eup %370 }
 0x225   :  { %v219_v7 = vmul.f32 %v371_v6, %v197_v5 }
 0x227   :  { %v223_v8 = vrot.slane %v219_v7, %v121_v32 }
 0x229   :  { %v224_v10 = vmul.f32 %v223_v8, %v207_v58 }
 0x22b   :  { %v229_v11 = vadd.f32 %v321_v9, %v224_v10 }
 0x22d   :  { %v230_v12 = vmax.f32 %v229_v11, 0.0 }
 0x22f   :  { %v231_v13 = vpack.c.bf16 %v230_v12, %v230_v12 }
 0x231   :  { %356 = vmatmul.mubr.msk.bf16.vlgmr.msra.gmra.mrb[4].mxu0 %vm32_vm1, %v231_v13 }
 0x304   :  { %v292_v15 = vpop.f32.mrb[4].mxu0 }
 0x305   :  { %v293_v16 = vadd.f32 %v322_v14, %v292_v15  ;;  %v357_v17 = vpop.f32.mrb[5].mxu0 }
 0x306   :  { %v295_v18 = vpop.f32.mrb[6].mxu0 }
 0x307   :  { %v358_v19 = vpop.f32.mrb[7].mxu0  ;;  %299 = vst.msk [vmem:[#allocation3] sm:$0xff] %vm298_vm2, %v293_v16 }
 0x308   :  { %383 = shalt.err (!%p380_p4)
}
 0x309   :  { %s384_s6 = scalar_lea.hbm %s503_s7, 128 }
 0x30a   :  { %p385_p5 = scmp.ne.s32.totalorder %s503_s7, %s384_s6  ;;  %p388_p6 = scmp.lt.u32.totalorder %s384_s6, %s503_s7 }
 0x30c   :  { %p390_p7 = pnand %p388_p6, %p385_p5 }
 0x30e   :  { %393 = shalt.err (!%p390_p7)
}
 0x30f   :  { %309 = dma.vmem_to_hbm [thread:$0]  %s307_s21, 128, %s503_s7, [#allocation4]  }
 0x310   :  { %394 = dma.done.wait [#allocation4], 128  }
 0x311   :  { %395 = vsyncadd [#allocation4], 4294967168 }
 0x312   :  { %313 = vsyncpa [#allocation4], 1 }

</bundles_post_ra>
